<compile_context>
chip_gen: v7x
topology: tpu7x:2x2x1
jax: 0.10.0
libtpu: 0.0.40
codegen_flags: <defaults>
</compile_context>

<pallas_src>
import functools

import jax
import jax.numpy as jnp
import numpy as np
from jax.experimental import pallas as pl
from jax.experimental.pallas import tpu as pltpu


_SUBLANE = 8
_MAX_TM = 512


def _round_up(x, m):
    return ((x + m - 1) // m) * m


def _compiler_params():
    try:
        return pltpu.CompilerParams(
            dimension_semantics=("parallel",),
            vmem_limit_bytes=48 * 1024 * 1024)
    except Exception:                      # older/newer API: fall back to defaults
        return None


def _choose_tm(m_out, off_max):
    tm = max(_SUBLANE, min(_MAX_TM, _round_up(m_out, _SUBLANE)))
    tm = max(tm, _round_up(max(off_max, 1), _SUBLANE))
    return tm


# ----------------------------------------------------------------------------
# Pallas kernels
# ----------------------------------------------------------------------------
def _conv_rows_halo_kernel(xc_ref, xn_ref, w_ref, scale_ref, bias_ref, o_ref,
                           x_buf, *, offs, off_max, leaky_slope):
    """Row-tiled conv: sum_t x[rows + offs[t]] @ W[t] -> folded BN -> LeakyReLU.

    xc_ref : (tm, K)      current row block (bf16)
    xn_ref : (tm, K)      next row block (halo source, bf16)
    w_ref  : (T, K, Cout) per-tap weights (bf16)
    x_buf  : VMEM scratch (tm + pad, K): current rows followed by halo rows.
    """
    tm = o_ref.shape[0]
    x_buf[0:tm, :] = xc_ref[...]
    x_buf[tm:tm + off_max, :] = xn_ref[0:off_max, :]

    acc = None
    for t, off in enumerate(offs):
        xt = x_buf[off:off + tm, :]
        d = jnp.dot(xt, w_ref[t], preferred_element_type=jnp.float32)
        acc = d if acc is None else acc + d

    y = acc * scale_ref[...] + bias_ref[...]
    o_ref[...] = jnp.where(y >= 0.0, y, y * leaky_slope).astype(o_ref.dtype)


def _conv_rows_kernel(x_ref, w_ref, scale_ref, bias_ref, o_ref, *, leaky_slope):
    """1x1 conv (single tap): (tm,K)@(K,Cout) -> folded BN -> LeakyReLU."""
    acc = jnp.dot(x_ref[...], w_ref[0], preferred_element_type=jnp.float32)
    y = acc * scale_ref[...] + bias_ref[...]
    o_ref[...] = jnp.where(y >= 0.0, y, y * leaky_slope).astype(o_ref.dtype)


def _fusion_kernel(f0_ref, f1_ref, f2_ref,
                   w0_ref, s0_ref, b0_ref,
                   w1_ref, s1_ref, b1_ref,
                   w2_ref, s2_ref, b2_ref,
                   wl_ref, bl_ref, o_ref, *, leaky_slope):
    """Adaptive fusion: per-level 1x1 conv+BN+leaky, weight_levels 1x1 conv,
    softmax over the 3 levels, weighted sum of the three feature maps."""

    def weight_v(f_ref, w_r, s_r, b_r):
        v = jnp.dot(f_ref[...], w_r[...], preferred_element_type=jnp.float32)
        v = v * s_r[...] + b_r[...]
        return jnp.where(v >= 0.0, v, v * leaky_slope)

    cc = w0_ref.shape[-1]
    v0 = weight_v(f0_ref, w0_ref, s0_ref, b0_ref)
    v1 = weight_v(f1_ref, w1_ref, s1_ref, b1_ref)
    v2 = weight_v(f2_ref, w2_ref, s2_ref, b2_ref)

    # weight_levels 1x1 conv over the concatenated (3*cc) channels, expressed
    # as three small matmuls (avoids an in-kernel channel concat relayout).
    wl = wl_ref[...]
    logits = (jnp.dot(v0, wl[0:cc, :], preferred_element_type=jnp.float32)
              + jnp.dot(v1, wl[cc:2 * cc, :], preferred_element_type=jnp.float32)
              + jnp.dot(v2, wl[2 * cc:3 * cc, :], preferred_element_type=jnp.float32)
              + bl_ref[...])

    m = jnp.max(logits, axis=-1, keepdims=True)
    e = jnp.exp(logits - m)
    denom = jnp.sum(e, axis=-1, keepdims=True)
    try:
        sm = e * pl.reciprocal(denom, approx=True)     # EUP slot
    except Exception:
        sm = e / denom

    f0 = f0_ref[...].astype(jnp.float32)
    f1 = f1_ref[...].astype(jnp.float32)
    f2 = f2_ref[...].astype(jnp.float32)
    fused = f0 * sm[:, 0:1] + f1 * sm[:, 1:2] + f2 * sm[:, 2:3]
    o_ref[...] = fused.astype(o_ref.dtype)


# ----------------------------------------------------------------------------
# Conv + BN + LeakyReLU wrapper (shifted-rows matmul formulation, no im2col)
# ----------------------------------------------------------------------------
def conv_bn_leaky(x_nhwc, p, ksize, stride, slope=0.1, out_dtype=jnp.bfloat16):
    n, h, w_sp, c = x_nhwc.shape
    kh, kw, cin, cout = p['w'].shape
    assert (kh, kw) == (ksize, ksize) and cin == c

    if ksize == 1 and stride == 1:
        hv, wv, ho, wo = h, w_sp, h, w_sp
        x_flat = x_nhwc.reshape(n * hv * wv, c)
        wt = p['w'].reshape(1, c, cout)
        offs = (0,)
    elif ksize == 3 and stride == 1:
        xp = jnp.pad(x_nhwc, ((0, 0), (1, 1), (1, 1), (0, 0)))
        hv, wv = h + 2, w_sp + 2
        ho, wo = h, w_sp
        x_flat = xp.reshape(n * hv * wv, c)
        wt = p['w'].reshape(9, c, cout)
        offs = tuple(dy * wv + dx for dy in range(3) for dx in range(3))
    elif ksize == 3 and stride == 2:
        xp = jnp.pad(x_nhwc, ((0, 0), (1, 1), (1, 1), (0, 0)))
        hp, wp = h + 2, w_sp + 2
        ho = (hp - 3) // 2 + 1
        wo = (wp - 3) // 2 + 1
        hv, wv = ho + 1, wo + 1
        # Phase split (space-to-depth by the stride): the strided 3x3 conv
        # becomes a stride-1 2x2 conv over 4*c channels -> 4 shifted matmuls.
        phases = []
        for pb in range(2):
            for pc in range(2):
                ph = xp[:, pb::2, pc::2, :][:, :hv, :wv, :]
                ph = jnp.pad(ph, ((0, 0), (0, hv - ph.shape[1]),
                                  (0, wv - ph.shape[2]), (0, 0)))
                phases.append(ph)
        x_flat = jnp.concatenate(phases, axis=-1).reshape(n * hv * wv, 4 * c)
        wblocks = []
        for sy in range(2):
            for sx in range(2):
                rows = []
                for pb in range(2):
                    for pc in range(2):
                        dy, dx = 2 * sy + pb, 2 * sx + pc
                        if dy <= 2 and dx <= 2:
                            rows.append(p['w'][dy, dx])
                        else:
                            rows.append(jnp.zeros((c, cout), p['w'].dtype))
                wblocks.append(jnp.concatenate(rows, axis=0))
        wt = jnp.stack(wblocks, axis=0)                    # (4, 4c, cout)
        offs = tuple(sy * wv + sx for sy in range(2) for sx in range(2))
    else:
        raise NotImplementedError((ksize, stride))

    k_dim = x_flat.shape[1]
    t_taps = wt.shape[0]
    off_max = max(offs)
    m_out = n * hv * wv
    tm = _choose_tm(m_out, off_max)
    nb = pl.cdiv(m_out, tm)
    m_pad_out = nb * tm
    rows_in = (nb + 1) * tm if off_max > 0 else nb * tm

    # bf16 MXU operands; f32 accumulation / BN / activation inside the kernel.
    x_flat = x_flat.astype(jnp.bfloat16)
    x_flat = jnp.pad(x_flat, ((0, rows_in - x_flat.shape[0]), (0, 0)))
    wt = wt.astype(jnp.bfloat16)
    scale = p['scale'].reshape(1, cout).astype(jnp.float32)
    bias = p['bias'].reshape(1, cout).astype(jnp.float32)

    w_spec = pl.BlockSpec((t_taps, k_dim, cout), lambda i: (0, 0, 0))
    vec_spec = pl.BlockSpec((1, cout), lambda i: (0, 0))
    row_spec = pl.BlockSpec((tm, k_dim), lambda i: (i, 0))
    out_spec = pl.BlockSpec((tm, cout), lambda i: (i, 0))

    if off_max > 0:
        kernel = functools.partial(_conv_rows_halo_kernel, offs=offs,
                                   off_max=off_max, leaky_slope=slope)
        halo_spec = pl.BlockSpec((tm, k_dim), lambda i: (i + 1, 0))
        y = pl.pallas_call(
            kernel,
            out_shape=jax.ShapeDtypeStruct((m_pad_out, cout), out_dtype),
            grid=(nb,),
            in_specs=[row_spec, halo_spec, w_spec, vec_spec, vec_spec],
            out_specs=out_spec,
            scratch_shapes=[pltpu.VMEM(
                (tm + _round_up(off_max, _SUBLANE), k_dim), jnp.bfloat16)],
            compiler_params=_compiler_params(),
        )(x_flat, x_flat, wt, scale, bias)
    else:
        kernel = functools.partial(_conv_rows_kernel, leaky_slope=slope)
        y = pl.pallas_call(
            kernel,
            out_shape=jax.ShapeDtypeStruct((m_pad_out, cout), out_dtype),
            grid=(nb,),
            in_specs=[row_spec, w_spec, vec_spec, vec_spec],
            out_specs=out_spec,
            compiler_params=_compiler_params(),
        )(x_flat, wt, scale, bias)

    return y[:m_out].reshape(n, hv, wv, cout)[:, :ho, :wo, :]


# ----------------------------------------------------------------------------
# Adaptive fusion wrapper
# ----------------------------------------------------------------------------
def fuse_levels(l0, l1, l2, params, slope=0.1):
    n, h, w_sp, c = l0.shape
    m = n * h * w_sp
    cc = params['compress_c']
    tm = max(_SUBLANE, min(_MAX_TM, _round_up(m, _SUBLANE)))
    nb = pl.cdiv(m, tm)
    mp = nb * tm

    def prep(x):
        xf = x.reshape(m, c).astype(jnp.bfloat16)
        return jnp.pad(xf, ((0, mp - m), (0, 0)))

    f0, f1, f2 = prep(l0), prep(l1), prep(l2)

    def wsb(name):
        p = params[name]
        return (p['w'].reshape(c, cc).astype(jnp.bfloat16),
                p['scale'].reshape(1, cc).astype(jnp.float32),
                p['bias'].reshape(1, cc).astype(jnp.float32))

    w0, s0, b0 = wsb('weight_level_0')
    w1, s1, b1 = wsb('weight_level_1')
    w2, s2, b2 = wsb('weight_level_2')
    wl = params['weight_levels_w'].astype(jnp.float32)            # (3*cc, 3)
    bl = params['weight_levels_b'].reshape(1, 3).astype(jnp.float32)

    row_spec = pl.BlockSpec((tm, c), lambda i: (i, 0))

    def full(shape):
        return pl.BlockSpec(shape, lambda i: (0,) * len(shape))

    out = pl.pallas_call(
        functools.partial(_fusion_kernel, leaky_slope=slope),
        out_shape=jax.ShapeDtypeStruct((mp, c), jnp.bfloat16),
        grid=(nb,),
        in_specs=[row_spec, row_spec, row_spec,
                  full((c, cc)), full((1, cc)), full((1, cc)),
                  full((c, cc)), full((1, cc)), full((1, cc)),
                  full((c, cc)), full((1, cc)), full((1, cc)),
                  full((3 * cc, 3)), full((1, 3))],
        out_specs=pl.BlockSpec((tm, c), lambda i: (i, 0)),
        compiler_params=_compiler_params(),
    )(f0, f1, f2, w0, s0, b0, w1, s1, b1, w2, s2, b2, wl, bl)
    return out[:m].reshape(n, h, w_sp, c)


# ----------------------------------------------------------------------------
# Plain-JAX data-movement glue
# ----------------------------------------------------------------------------
def _nearest_upsample(x, factor):
    return jnp.repeat(jnp.repeat(x, factor, axis=1), factor, axis=2)


def _max_pool_3x3_s2_p1(x):
    return jax.lax.reduce_window(
        x, -jnp.inf, jax.lax.max,
        window_dimensions=(1, 3, 3, 1),
        window_strides=(1, 2, 2, 1),
        padding=((0, 0), (1, 1), (1, 1), (0, 0)))


# ----------------------------------------------------------------------------
# PFPN forward (shared structure for Pallas and reference paths)
# ----------------------------------------------------------------------------
def _pfpn_forward_impl(params, x0_nchw, x1_nchw, x2_nchw, conv_fn, fuse_fn):
    x0 = jnp.transpose(x0_nchw, (0, 2, 3, 1))
    x1 = jnp.transpose(x1_nchw, (0, 2, 3, 1))
    x2 = jnp.transpose(x2_nchw, (0, 2, 3, 1))
    level = params['level']

    if level == 0:
        l0 = x0
        l1 = conv_fn(x1, params['stride_level_1'], 3, 2)
        x2d = _max_pool_3x3_s2_p1(x2)
        l2 = conv_fn(x2d, params['stride_level_2'], 3, 2)
    elif level == 1:
        c0 = conv_fn(x0, params['compress_level_0'], 1, 1)
        l0 = _nearest_upsample(c0, 2)
        l1 = x1
        l2 = conv_fn(x2, params['stride_level_2'], 3, 2)
    else:  # level == 2
        c0 = conv_fn(x0, params['compress_level_0'], 1, 1)
        l0 = _nearest_upsample(c0, 4)
        c1 = conv_fn(x1, params['compress_level_1'], 1, 1)
        l1 = _nearest_upsample(c1, 2)
        l2 = x2

    fused = fuse_fn(l0, l1, l2, params)
    out = conv_fn(fused, params['expand'], 3, 1)
    return jnp.transpose(out, (0, 3, 1, 2)).astype(x0_nchw.dtype)   # NCHW


def pfpn_forward(params, x0, x1, x2):
    return _pfpn_forward_impl(params, x0, x1, x2, conv_bn_leaky, fuse_levels)


# ---------------- pure-JAX reference (for correctness check) ----------------
def _ref_conv_bn_leaky(x, p, ksize, stride, slope=0.1):
    pad = (ksize - 1) // 2
    y = jax.lax.conv_general_dilated(
        x, p['w'], window_strides=(stride, stride),
        padding=((pad, pad), (pad, pad)),
        dimension_numbers=('NHWC', 'HWIO', 'NHWC'))
    y = y * p['scale'] + p['bias']
    return jnp.where(y >= 0, y, slope * y)


def _ref_fuse(l0, l1, l2, params):
    cc = params['compress_c']
    v = jnp.concatenate([
        _ref_conv_bn_leaky(l0, params['weight_level_0'], 1, 1),
        _ref_conv_bn_leaky(l1, params['weight_level_1'], 1, 1),
        _ref_conv_bn_leaky(l2, params['weight_level_2'], 1, 1)], axis=-1)
    wl = params['weight_levels_w'].reshape(1, 1, 3 * cc, 3)
    logits = jax.lax.conv_general_dilated(
        v, wl, (1, 1), 'VALID',
        dimension_numbers=('NHWC', 'HWIO', 'NHWC')) + params['weight_levels_b']
    sm = jax.nn.softmax(logits, axis=-1)
    return l0 * sm[..., 0:1] + l1 * sm[..., 1:2] + l2 * sm[..., 2:3]


def pfpn_forward_ref(params, x0, x1, x2):
    return _pfpn_forward_impl(params, x0, x1, x2, _ref_conv_bn_leaky, _ref_fuse)


# ----------------------------------------------------------------------------
# Deterministic parameter init (synthetic; eval-mode folded BatchNorm)
# ----------------------------------------------------------------------------
def _init_conv_bn(key, kh, kw, cin, cout, eps=1e-5):
    k1, k2, k3, k4, k5 = jax.random.split(key, 5)
    w = 0.1 * jax.random.normal(k1, (kh, kw, cin, cout), jnp.float32)   # HWIO
    gamma = 1.0 + 0.1 * jax.random.normal(k2, (cout,), jnp.float32)
    beta = 0.1 * jax.random.normal(k3, (cout,), jnp.float32)
    mean = 0.1 * jax.random.normal(k4, (cout,), jnp.float32)
    var = 1.0 + 0.1 * jnp.abs(jax.random.normal(k5, (cout,), jnp.float32))
    scale = gamma / jnp.sqrt(var + eps)
    bias = beta - mean * scale
    return dict(w=w, scale=scale, bias=bias)


def init_pfpn_params(key, level, dims=(64, 32, 16), compress_c=16):
    """Scaled-down PFPN: original dims [512,256,128] -> small synthetic dims."""
    inter = dims[level]
    keys = jax.random.split(key, 8)
    p = {'level': level, 'dims': dims, 'inter': inter, 'compress_c': compress_c}
    if level == 0:
        p['stride_level_1'] = _init_conv_bn(keys[0], 3, 3, dims[1], inter)
        p['stride_level_2'] = _init_conv_bn(keys[1], 3, 3, dims[2], inter)
        p['expand'] = _init_conv_bn(keys[2], 3, 3, inter, dims[0])
    elif level == 1:
        p['compress_level_0'] = _init_conv_bn(keys[0], 1, 1, dims[0], inter)
        p['stride_level_2'] = _init_conv_bn(keys[1], 3, 3, dims[2], inter)
        p['expand'] = _init_conv_bn(keys[2], 3, 3, inter, dims[1])
    else:
        p['compress_level_0'] = _init_conv_bn(keys[0], 1, 1, dims[0], inter)
        p['compress_level_1'] = _init_conv_bn(keys[1], 1, 1, dims[1], inter)
        p['expand'] = _init_conv_bn(keys[2], 3, 3, inter, dims[2])
    p['weight_level_0'] = _init_conv_bn(keys[3], 1, 1, inter, compress_c)
    p['weight_level_1'] = _init_conv_bn(keys[4], 1, 1, inter, compress_c)
    p['weight_level_2'] = _init_conv_bn(keys[5], 1, 1, inter, compress_c)
    p['weight_levels_w'] = 0.1 * jax.random.normal(keys[6], (3 * compress_c, 3),
                                                   jnp.float32)
    p['weight_levels_b'] = 0.1 * jax.random.normal(keys[7], (3,), jnp.float32)
    return p


# ----------------------------------------------------------------------------
if __name__ == "__main__":
    key = jax.random.PRNGKey(0)
    kp, k0, k1, k2 = jax.random.split(key, 4)

    dims = (64, 32, 16)            # scaled-down [512, 256, 128]
    N, H = 2, 4
    # FPN pyramid: level 0 coarsest, level 2 finest (NCHW inputs).
    x_level_0 = jax.random.normal(k0, (N, dims[0], H, H), jnp.float32)
    x_level_1 = jax.random.normal(k1, (N, dims[1], 2 * H, 2 * H), jnp.float32)
    x_level_2 = jax.random.normal(k2, (N, dims[2], 4 * H, 4 * H), jnp.float32)

    for level in (0, 1, 2):
        params = init_pfpn_params(jax.random.fold_in(kp, level), level,
                                  dims=dims, compress_c=16)
        out = jax.block_until_ready(
            pfpn_forward(params, x_level_0, x_level_1, x_level_2))
        expect = (N, dims[level], (2 ** level) * H, (2 ** level) * H)
        assert out.shape == expect, (out.shape, expect)

        ref = jax.block_until_ready(
            pfpn_forward_ref(params, x_level_0, x_level_1, x_level_2))
        np.testing.assert_allclose(np.asarray(out), np.asarray(ref),
                                   rtol=5e-2, atol=5e-2)

    print("KERNEL_OK")
</pallas_src>

<mosaic_0001>
module attributes {stable_mosaic.version = 11 : i64} {
  func.func @_conv_rows_halo_kernel(%arg0: i32, %arg1: memref<56x128xbf16, #tpu.memory_space<vmem>>, %arg2: memref<56x128xbf16, #tpu.memory_space<vmem>>, %arg3: memref<4x128x64xbf16, #tpu.memory_space<vmem>>, %arg4: memref<1x64xf32, #tpu.memory_space<vmem>>, %arg5: memref<1x64xf32, #tpu.memory_space<vmem>>, %arg6: memref<56x64xbf16, #tpu.memory_space<vmem>>, %arg7: memref<64x128xbf16, #tpu.memory_space<vmem>>) attributes {dimension_semantics = [#tpu.dimension_semantics<parallel>], iteration_bounds = array<i64: 1>, scalar_prefetch = 0 : i64, scratch_operands = 1 : i64, tpu.core_type = #tpu.core_type<tc>, window_params = [{transform_indices = @transform_0, window_bounds = array<i64: 56, 128>}, {transform_indices = @transform_1, window_bounds = array<i64: 56, 128>}, {pipeline_mode = #tpu.pipeline_mode<synchronous>, transform_indices = @transform_2, window_bounds = array<i64: 4, 128, 64>}, {pipeline_mode = #tpu.pipeline_mode<synchronous>, transform_indices = @transform_3, window_bounds = array<i64: 1, 64>}, {pipeline_mode = #tpu.pipeline_mode<synchronous>, transform_indices = @transform_4, window_bounds = array<i64: 1, 64>}, {transform_indices = @transform_5, window_bounds = array<i64: 56, 64>}]} {
    %c0 = arith.constant 0 : index
    %c0_0 = arith.constant 0 : index
    %0 = vector.load %arg1[%c0, %c0_0] : memref<56x128xbf16, #tpu.memory_space<vmem>>, vector<56x128xbf16>
    %c0_1 = arith.constant 0 : index
    %c0_2 = arith.constant 0 : index
    %1 = vector.load %arg7[%c0_1, %c0_2] : memref<64x128xbf16, #tpu.memory_space<vmem>>, vector<56x128xbf16>
    tpu.vector_store %arg7[%c0_1, %c0_2], %0 {strides = array<i32>} : memref<64x128xbf16, #tpu.memory_space<vmem>>, vector<56x128xbf16>,
    %c0_3 = arith.constant 0 : index
    %c0_4 = arith.constant 0 : index
    %2 = vector.load %arg2[%c0_3, %c0_4] : memref<56x128xbf16, #tpu.memory_space<vmem>>, vector<6x128xbf16>
    %c56 = arith.constant 56 : index
    %c0_5 = arith.constant 0 : index
    %3 = vector.load %arg7[%c56, %c0_5] : memref<64x128xbf16, #tpu.memory_space<vmem>>, vector<6x128xbf16>
    tpu.vector_store %arg7[%c56, %c0_5], %2 {strides = array<i32>} : memref<64x128xbf16, #tpu.memory_space<vmem>>, vector<6x128xbf16>,
    %c0_6 = arith.constant 0 : index
    %c0_7 = arith.constant 0 : index
    %4 = vector.load %arg7[%c0_6, %c0_7] : memref<64x128xbf16, #tpu.memory_space<vmem>>, vector<56x128xbf16>
    %c0_8 = arith.constant 0 : index
    %c0_9 = arith.constant 0 : index
    %c0_10 = arith.constant 0 : index
    %5 = vector.load %arg3[%c0_8, %c0_9, %c0_10] : memref<4x128x64xbf16, #tpu.memory_space<vmem>>, vector<1x128x64xbf16>
    %6 = vector.shape_cast %5 : vector<1x128x64xbf16> to vector<128x64xbf16>
    %cst = arith.constant dense<0.000000e+00> : vector<56x64xf32>
    %7 = tpu.matmul %4, %6, %cst {dimension_numbers = #tpu.dot_dimension_numbers<[1], [0], [0], [1], [0, 0, 1, 1], [], []>} : vector<56x128xbf16>, vector<128x64xbf16>, vector<56x64xf32> -> vector<56x64xf32>
    %c1 = arith.constant 1 : index
    %c0_11 = arith.constant 0 : index
    %8 = vector.load %arg7[%c1, %c0_11] : memref<64x128xbf16, #tpu.memory_space<vmem>>, vector<56x128xbf16>
    %c1_12 = arith.constant 1 : index
    %c0_13 = arith.constant 0 : index
    %c0_14 = arith.constant 0 : index
    %9 = vector.load %arg3[%c1_12, %c0_13, %c0_14] : memref<4x128x64xbf16, #tpu.memory_space<vmem>>, vector<1x128x64xbf16>
    %10 = vector.shape_cast %9 : vector<1x128x64xbf16> to vector<128x64xbf16>
    %cst_15 = arith.constant dense<0.000000e+00> : vector<56x64xf32>
    %11 = tpu.matmul %8, %10, %cst_15 {dimension_numbers = #tpu.dot_dimension_numbers<[1], [0], [0], [1], [0, 0, 1, 1], [], []>} : vector<56x128xbf16>, vector<128x64xbf16>, vector<56x64xf32> -> vector<56x64xf32>
    %12 = arith.addf %7, %11 : vector<56x64xf32>
    %c5 = arith.constant 5 : index
    %c0_16 = arith.constant 0 : index
    %13 = vector.load %arg7[%c5, %c0_16] : memref<64x128xbf16, #tpu.memory_space<vmem>>, vector<56x128xbf16>
    %c2 = arith.constant 2 : index
    %c0_17 = arith.constant 0 : index
    %c0_18 = arith.constant 0 : index
    %14 = vector.load %arg3[%c2, %c0_17, %c0_18] : memref<4x128x64xbf16, #tpu.memory_space<vmem>>, vector<1x128x64xbf16>
    %15 = vector.shape_cast %14 : vector<1x128x64xbf16> to vector<128x64xbf16>
    %cst_19 = arith.constant dense<0.000000e+00> : vector<56x64xf32>
    %16 = tpu.matmul %13, %15, %cst_19 {dimension_numbers = #tpu.dot_dimension_numbers<[1], [0], [0], [1], [0, 0, 1, 1], [], []>} : vector<56x128xbf16>, vector<128x64xbf16>, vector<56x64xf32> -> vector<56x64xf32>
    %17 = arith.addf %12, %16 : vector<56x64xf32>
    %c6 = arith.constant 6 : index
    %c0_20 = arith.constant 0 : index
    %18 = vector.load %arg7[%c6, %c0_20] : memref<64x128xbf16, #tpu.memory_space<vmem>>, vector<56x128xbf16>
    %c3 = arith.constant 3 : index
    %c0_21 = arith.constant 0 : index
    %c0_22 = arith.constant 0 : index
    %19 = vector.load %arg3[%c3, %c0_21, %c0_22] : memref<4x128x64xbf16, #tpu.memory_space<vmem>>, vector<1x128x64xbf16>
    %20 = vector.shape_cast %19 : vector<1x128x64xbf16> to vector<128x64xbf16>
    %cst_23 = arith.constant dense<0.000000e+00> : vector<56x64xf32>
    %21 = tpu.matmul %18, %20, %cst_23 {dimension_numbers = #tpu.dot_dimension_numbers<[1], [0], [0], [1], [0, 0, 1, 1], [], []>} : vector<56x128xbf16>, vector<128x64xbf16>, vector<56x64xf32> -> vector<56x64xf32>
    %22 = arith.addf %17, %21 : vector<56x64xf32>
    %c0_24 = arith.constant 0 : index
    %c0_25 = arith.constant 0 : index
    %23 = vector.load %arg4[%c0_24, %c0_25] : memref<1x64xf32, #tpu.memory_space<vmem>>, vector<1x64xf32>
    %24 = vector.broadcast %23 : vector<1x64xf32> to vector<56x64xf32>
    %25 = arith.mulf %22, %24 : vector<56x64xf32>
    %c0_26 = arith.constant 0 : index
    %c0_27 = arith.constant 0 : index
    %26 = vector.load %arg5[%c0_26, %c0_27] : memref<1x64xf32, #tpu.memory_space<vmem>>, vector<1x64xf32>
    %27 = vector.broadcast %26 : vector<1x64xf32> to vector<56x64xf32>
    %28 = arith.addf %25, %27 : vector<56x64xf32>
    %cst_28 = arith.constant 0.000000e+00 : f32
    %29 = vector.broadcast %cst_28 : f32 to vector<56x64xf32>
    %30 = arith.cmpf oge, %28, %29 : vector<56x64xf32>
    %cst_29 = arith.constant 1.000000e-01 : f32
    %31 = vector.broadcast %cst_29 : f32 to vector<56x64xf32>
    %32 = arith.mulf %28, %31 : vector<56x64xf32>
    %33 = arith.select %30, %28, %32 : vector<56x64xi1>, vector<56x64xf32>
    %34 = arith.truncf %33 : vector<56x64xf32> to vector<56x64xbf16>
    %c0_30 = arith.constant 0 : index
    %c0_31 = arith.constant 0 : index
    %35 = vector.load %arg6[%c0_30, %c0_31] : memref<56x64xbf16, #tpu.memory_space<vmem>>, vector<56x64xbf16>
    tpu.vector_store %arg6[%c0_30, %c0_31], %34 {strides = array<i32>} : memref<56x64xbf16, #tpu.memory_space<vmem>>, vector<56x64xbf16>,
    return
  }
  func.func @transform_0(%arg0: i32) -> (i32, i32) {
    %c0_i32 = arith.constant 0 : i32
    %c0_i32_0 = arith.constant 0 : i32
    return %arg0, %c0_i32 : i32, i32
  }
  func.func @transform_1(%arg0: i32) -> (i32, i32) {
    %c1_i32 = arith.constant 1 : i32
    %0 = arith.addi %arg0, %c1_i32 : i32
    %c0_i32 = arith.constant 0 : i32
    %c0_i32_0 = arith.constant 0 : i32
    return %0, %c0_i32 : i32, i32
  }
  func.func @transform_2(%arg0: i32) -> (i32, i32, i32) {
    %c0_i32 = arith.constant 0 : i32
    %c0_i32_0 = arith.constant 0 : i32
    %c0_i32_1 = arith.constant 0 : i32
    %c0_i32_2 = arith.constant 0 : i32
    return %c0_i32, %c0_i32_0, %c0_i32_1 : i32, i32, i32
  }
  func.func @transform_3(%arg0: i32) -> (i32, i32) {
    %c0_i32 = arith.constant 0 : i32
    %c0_i32_0 = arith.constant 0 : i32
    %c0_i32_1 = arith.constant 0 : i32
    return %c0_i32, %c0_i32_0 : i32, i32
  }
  func.func @transform_4(%arg0: i32) -> (i32, i32) {
    %c0_i32 = arith.constant 0 : i32
    %c0_i32_0 = arith.constant 0 : i32
    %c0_i32_1 = arith.constant 0 : i32
    return %c0_i32, %c0_i32_0 : i32, i32
  }
  func.func @transform_5(%arg0: i32) -> (i32, i32) {
    %c0_i32 = arith.constant 0 : i32
    %c0_i32_0 = arith.constant 0 : i32
    return %arg0, %c0_i32 : i32, i32
  }
}

</mosaic_0001>

<bundles_post_ra>
// kernel: tpu_custom_call.1
= control target key start
LH: loop header
LB: loop body
LE: loop exit
PB: predicated region body
PF: predicated region fallthrough
CT: control target
= control target key end

     0   :  { %vm121_vm0 = vsmask.f32 7424  ;;  %vm400_vm1 = vsmask.f32 5376  ;;  %s1343_s0 = inlined_call_operand.vmem [shape: bf16[112,128], index: 0, kind: input, shape index: {}]   ;;  %s1344_s1 = inlined_call_operand.vmem [shape: bf16[112,128], index: 1, kind: input, shape index: {}]   ;;  %s1345_s2 = inlined_call_operand.vmem [shape: bf16[4,128,64], index: 2, kind: input, shape index: {}]   ;;  %s1346_s3 = inlined_call_operand.vmem [shape: f32[1,64], index: 3, kind: input, shape index: {}]   ;;  %s1347_s4 = inlined_call_operand.vmem [shape: f32[1,64], index: 4, kind: input, shape index: {}]   ;;  %s1348_s5 = inlined_call_operand.hbm [shape: bf16[56,64], index: 5, kind: output, shape index: {}]  }
   0x1   :  { %v1082_v0 = vld [vmem:[%s1345_s2 + $0x40] sm:$0xff]   ;;  %v1084_v2 = vld [vmem:[%s1345_s2 + $0x48] sm:$0xff]   ;;  %v1086_v4 = vld [vmem:[%s1345_s2 + $0x50] sm:$0xff]  }
   0x2   :  { %v1083_v1 = vld [vmem:[%s1345_s2 + $0x80] sm:$0xff]   ;;  %960 = vmatprep.subr.bf16.mxu1 %v1082_v0  ;;  %v1085_v3 = vld [vmem:[%s1345_s2 + $0x88] sm:$0xff]   ;;  %v1087_v5 = vld [vmem:[%s1345_s2 + $0x90] sm:$0xff]  }
   0x3   :  { %1008 = vmatprep.subr.bf16.mxu0 %v1083_v1  ;;  %961 = vmatpush3.bf16.msra.mxu1 %v1082_v0  ;;  %v1088_v6 = vld [vmem:[%s1345_s2 + $0x58] sm:$0xff]   ;;  %v1090_v8 = vld [vmem:[%s1345_s2 + $0x60] sm:$0xff]   ;;  %v1092_v10 = vld [vmem:[%s1345_s2 + $0x68] sm:$0xff]  }
   0x4   :  { %1009 = vmatpush3.bf16.msra.mxu0 %v1083_v1  ;;  %962 = vmatprep.subr.bf16.mxu1 %v1084_v2  ;;  %v1089_v7 = vld [vmem:[%s1345_s2 + $0x98] sm:$0xff]   ;;  %v1091_v9 = vld [vmem:[%s1345_s2 + $0xa0] sm:$0xff]   ;;  %v1093_v11 = vld [vmem:[%s1345_s2 + $0xa8] sm:$0xff]  }
   0x5   :  { %1010 = vmatprep.subr.bf16.mxu0 %v1085_v3  ;;  %v1215_v12 = vld [vmem:[%s1343_s0] sm:$0xff]   ;;  %v1220_v13 = vld [vmem:[%s1343_s0 + $0x8] sm:$0xff]   ;;  %v1094_v14 = vld [vmem:[%s1345_s2 + $0x70] sm:$0xff]  }
   0x6   :  { %73 = vst [vmem:[#allocation2] sm:$0xff] %v1215_v12  ;;  %v123_v15 = vshrl.u32 %v1215_v12, 16  ;;  %v125_v16 = vshll.u32 %v1215_v12, 16  ;;  %v130_v17 = vshll.u32 %v1220_v13, 16  ;;  %v1095_v18 = vld [vmem:[%s1345_s2 + $0xb0] sm:$0xff]   ;;  %v134_v19 = vshrl.u32 %v1220_v13, 16 }
   0x7   :  { %963 = vmatpush3.bf16.msra.mxu1 %v1084_v2  ;;  %v1236_v20 = vld [vmem:[%s1343_s0 + $0x10] sm:$0xff]   ;;  %v1096_v23 = vld [vmem:[%s1345_s2 + $0x78] sm:$0xff]   ;;  %v1100_v34 = vld [vmem:[%s1345_s2] sm:$0xff]  }
   0x8   :  { %1011 = vmatpush3.bf16.msra.mxu0 %v1085_v3  ;;  %964 = vmatprep.subr.bf16.mxu1 %v1086_v4  ;;  %v127_v21 = vrot.slane %v125_v16, 1  ;;  %v132_v22 = vrot.slane %v130_v17, 1  ;;  %v138_v24 = vshll.u32 %v1236_v20, 16  ;;  %v142_v25 = vshrl.u32 %v1236_v20, 16  ;;  %v1097_v26 = vld [vmem:[%s1345_s2 + $0xb8] sm:$0xff]   ;;  %v1101_v43 = vld [vmem:[%s1345_s2 + $0xc0] sm:$0xff]  }
   0x9   :  { %1012 = vmatprep.subr.bf16.mxu0 %v1087_v5  ;;  %v409_v28 = vrot.slane %v134_v19, 2  ;;  %v410_v29 = vrot.slane %v130_v17, 3  ;;  %v1103_v47 = vld [vmem:[%s1345_s2 + $0x8] sm:$0xff]   ;;  %v1113_v50 = vld [vmem:[%s1343_s0 + $0x18] ss:$0 sps:$4 sm:$0xff]   ;;  %v1105_v52 = vld [vmem:[%s1345_s2 + $0x10] sm:$0xff]  }
   0xa   :  { %v128_v27 = vor.u32 %v127_v21, %v123_v15  ;;  %v413_v30 = vrot.slane %v142_v25, 2  ;;  %v414_v31 = vrot.slane %v138_v24, 3  ;;  %v136_v37 = vor.u32 %v134_v19, %v132_v22  ;;  %v1104_v49 = vld [vmem:[%s1345_s2 + $0xc8] sm:$0xff]   ;;  %v1114_v51 = vld [vmem:[%s1344_s1 + $0x1c] ss:$0 sps:$4 sm:$0x77]  }
   0xb   :  { %965 = vmatpush3.bf16.msra.mxu1 %v1086_v4  ;;  %v140_v38 = vrot.slane %v138_v24, 1  ;;  %v411_v39 = vor.u32 %v410_v29, %v409_v28  ;;  %76 = vst [vmem:[#allocation2 + $0x18] sm:$0xf] %v1113_v50  ;;  %82 = vst [vmem:[#allocation2 + $0x18] sm:$0x70] %v1114_v51  ;;  %v1106_v53 = vld [vmem:[%s1345_s2 + $0xd0] sm:$0xff]  }
   0xc   :  { %1013 = vmatpush3.bf16.msra.mxu0 %v1087_v5  ;;  %966 = vmatprep.subr.bf16.mxu1 %v1088_v6  ;;  %v133_v32 = vsel %vm121_vm0, %v128_v27, %v132_v22  ;;  %v1250_v40 = vor.u32 %v414_v31, %v413_v30 }
   0xd   :  { %1014 = vmatprep.subr.bf16.mxu0 %v1089_v7  ;;  %976 = vmatprep.mubr.bf16.mxu1 %v133_v32  ;;  %v381_v33 = vld [vmem:[#allocation2] sm:$0xfc]  ;;  %v141_v45 = vsel %vm121_vm0, %v136_v37, %v140_v38 }
   0xe   :  { %v402_v35 = vshrl.u32 %v381_v33, 16  ;;  %v405_v36 = vshll.u32 %v381_v33, 16  ;;  %v416_v46 = vsel %vm400_vm1, %v411_v39, %v1250_v40 }
   0xf   :  { %967 = vmatpush3.bf16.msra.mxu1 %v1088_v6 }
  0x10   :  { %1015 = vmatpush3.bf16.msra.mxu0 %v1089_v7  ;;  %968 = vmatprep.subr.bf16.mxu1 %v1090_v8  ;;  %v404_v41 = vrot.slane %v402_v35, 2  ;;  %v407_v42 = vrot.slane %v405_v36, 3 }
  0x11   :  { %1016 = vmatprep.subr.bf16.mxu0 %v1091_v9 }
  0x12   :  { %v408_v44 = vor.u32 %v407_v42, %v404_v41 }
  0x13   :  { %969 = vmatpush3.bf16.msra.mxu1 %v1090_v8 }
  0x14   :  { %1017 = vmatpush3.bf16.msra.mxu0 %v1091_v9  ;;  %970 = vmatprep.subr.bf16.mxu1 %v1092_v10  ;;  %v412_v48 = vsel %vm400_vm1, %v408_v44, %v411_v39 }
  0x15   :  { %1018 = vmatprep.subr.bf16.mxu0 %v1093_v11  ;;  %1024 = vmatprep.mubr.bf16.mxu0 %v412_v48 }
  0x17   :  { %971 = vmatpush3.bf16.msra.mxu1 %v1092_v10 }
  0x18   :  { %1019 = vmatpush3.bf16.msra.mxu0 %v1093_v11  ;;  %972 = vmatprep.subr.bf16.mxu1 %v1094_v14 }
  0x19   :  { %1020 = vmatprep.subr.bf16.mxu0 %v1095_v18 }
  0x1b   :  { %973 = vmatpush3.bf16.msra.mxu1 %v1094_v14 }
  0x1c   :  { %1021 = vmatpush3.bf16.msra.mxu0 %v1095_v18  ;;  %974 = vmatprep.subr.bf16.mxu1 %v1096_v23 }
  0x1d   :  { %1022 = vmatprep.subr.bf16.mxu0 %v1097_v26 }
  0x1f   :  { %975 = vmatpush3.bf16.msra.mxu1 %v1096_v23 }
  0x20   :  { %1023 = vmatpush3.bf16.msra.mxu0 %v1097_v26  ;;  %984 = vmatprep.subr.bf16.mxu1 %v1100_v34 }
  0x21   :  { %1032 = vmatprep.subr.bf16.mxu0 %v1101_v43 }
  0x22   :  { %977 = vmatmul.mubr.bf16.vlgmr.msra.gmra.mrb[0].mxu1 %v141_v45 }
  0x23   :  { %985 = vmatpush3.bf16.msra.mxu1 %v1100_v34  ;;  %1025 = vmatmul.mubr.bf16.vlgmr.msra.gmra.mrb[0].mxu0 %v416_v46 }
  0x24   :  { %1033 = vmatpush3.bf16.msra.mxu0 %v1101_v43  ;;  %986 = vmatprep.subr.bf16.mxu1 %v1103_v47 }
  0x25   :  { %1034 = vmatprep.subr.bf16.mxu0 %v1104_v49 }
  0x27   :  { %987 = vmatpush3.bf16.msra.mxu1 %v1103_v47 }
  0x28   :  { %10 = vsyncpa [#allocation4], 0  ;;  %1035 = vmatpush3.bf16.msra.mxu0 %v1104_v49  ;;  %988 = vmatprep.subr.bf16.mxu1 %v1105_v52  ;;  %v1107_v54 = vld [vmem:[%s1345_s2 + $0x18] sm:$0xff]   ;;  %v1109_v56 = vld [vmem:[%s1345_s2 + $0x20] sm:$0xff]   ;;  %v144_v58 = vor.u32 %v142_v25, %v140_v38  ;;  %v573_v6 = vrot.slane %v1220_v13, 3  ;;  %vm571_vm2 = vcmask 1044480  }
  0x29   :  { %1036 = vmatprep.subr.bf16.mxu0 %v1106_v53  ;;  %v1108_v55 = vld [vmem:[%s1345_s2 + $0xd8] sm:$0xff]   ;;  %v549_v0 = vld [vmem:[#allocation2] sm:$0xf8]  ;;  %v1111_v7 = vld [vmem:[%s1345_s2 + $0x28] sm:$0xff]   ;;  %v575_v21 = vrot.slane %v1236_v20, 3  ;;  %vm780_vm4 = vcmask 519168  }
  0x2a   :  { %v103_v57 = vld [vmem:[#allocation2 + $0x18] sm:$0x1f]  ;;  %v1110_v1 = vld [vmem:[%s1345_s2 + $0xe0] sm:$0xff]   ;;  %v572_v5 = vrot.slane %v549_v0, 3  ;;  %v1112_v11 = vld [vmem:[%s1345_s2 + $0xe8] sm:$0xff]  }
  0x2b   :  { %989 = vmatpush3.bf16.msra.mxu1 %v1105_v52  ;;  %v382_v59 = vld [vmem:[#allocation2 + $0x18] sm:$0x7f]  ;;  %v146_v60 = vshll.u32 %v103_v57, 16  ;;  %v150_v63 = vshrl.u32 %v103_v57, 16  ;;  %v1115_v16 = vld [vmem:[%s1345_s2 + $0x30] sm:$0xff]   ;;  %v576_v22 = vsel %vm571_vm2, %v573_v6, %v575_v21 }
  0x2c   :  { %1037 = vmatpush3.bf16.msra.mxu0 %v1106_v53  ;;  %990 = vmatprep.subr.bf16.mxu1 %v1107_v54  ;;  %v418_v61 = vshrl.u32 %v382_v59, 16  ;;  %v421_v62 = vshll.u32 %v382_v59, 16  ;;  %v574_v15 = vsel %vm571_vm2, %v572_v5, %v573_v6  ;;  %v1116_v17 = vld [vmem:[%s1345_s2 + $0xf0] sm:$0xff]   ;;  %v1117_v18 = vld [vmem:[%s1345_s2 + $0x38] sm:$0xff]   ;;  %v896_v27 = vld [vmem:[%s1346_s3] ss:$0 sm:$0xff] }
  0x2d   :  { %1038 = vmatprep.subr.bf16.mxu0 %v1108_v55  ;;  %v148_v2 = vrot.slane %v146_v60, 1  ;;  %v1118_v19 = vld [vmem:[%s1345_s2 + $0xf8] sm:$0xff]   ;;  %s1143_s3 = smov [#allocation3]  }
  0x2e   :  { %v420_v3 = vrot.slane %v418_v61, 2  ;;  %v423_v4 = vrot.slane %v421_v62, 3  ;;  %v86_v24 = vld [vmem:[#allocation2 + $0x18] sm:$0xf] }
  0x2f   :  { %991 = vmatpush3.bf16.msra.mxu1 %v1107_v54  ;;  %v149_v8 = vsel %vm121_vm0, %v144_v58, %v148_v2  ;;  %v152_v10 = vor.u32 %v150_v63, %v148_v2 }
  0x30   :  { %1039 = vmatpush3.bf16.msra.mxu0 %v1108_v55  ;;  %992 = vmatprep.subr.bf16.mxu1 %v1109_v56  ;;  %v424_v9 = vor.u32 %v423_v4, %v420_v3 }
  0x31   :  { %1040 = vmatprep.subr.bf16.mxu0 %v1110_v1  ;;  %980 = vmatprep.mubr.bf16.mxu1 %v149_v8 }
  0x32   :  { %v425_v14 = vsel %vm400_vm1, %v1250_v40, %v424_v9  ;;  %981 = vmatmul.mubr.bf16.gmra.mrb[4].mxu1 %v152_v10 }
  0x33   :  { %993 = vmatpush3.bf16.msra.mxu1 %v1109_v56  ;;  %1028 = vmatprep.mubr.bf16.mxu0 %v425_v14 }
  0x34   :  { %1041 = vmatpush3.bf16.msra.mxu0 %v1110_v1  ;;  %994 = vmatprep.subr.bf16.mxu1 %v1111_v7 }
  0x35   :  { %1042 = vmatprep.subr.bf16.mxu0 %v1112_v11  ;;  %1029 = vmatmul.mubr.bf16.gmra.mrb[4].mxu0 %v424_v9 }
  0x36   :  { %1000 = vmatprep.mubr.bf16.mxu1 %v1215_v12  ;;  %1048 = vmatprep.mubr.bf16.mxu0 %v574_v15  ;;  %v577_v12 = vrot.slane %v382_v59, 3 }
  0x37   :  { %995 = vmatpush3.bf16.msra.mxu1 %v1111_v7 }
  0x38   :  { %1043 = vmatpush3.bf16.msra.mxu0 %v1112_v11  ;;  %996 = vmatprep.subr.bf16.mxu1 %v1115_v16  ;;  %v578_v23 = vsel %vm571_vm2, %v575_v21, %v577_v12 }
  0x39   :  { %1044 = vmatprep.subr.bf16.mxu0 %v1116_v17 }
  0x3b   :  { %997 = vmatpush3.bf16.msra.mxu1 %v1115_v16 }
  0x3c   :  { %1045 = vmatpush3.bf16.msra.mxu0 %v1116_v17  ;;  %998 = vmatprep.subr.bf16.mxu1 %v1117_v18 }
  0x3d   :  { %1046 = vmatprep.subr.bf16.mxu0 %v1118_v19 }
  0x3f   :  { %999 = vmatpush3.bf16.msra.mxu1 %v1117_v18 }
  0x40   :  { %1047 = vmatpush3.bf16.msra.mxu0 %v1118_v19 }
  0x42   :  { %1001 = vmatmul.mubr.bf16.vlgmr.msra.gmra.mrb[0].mxu1 %v1220_v13  ;;  %v897_v13 = vld [vmem:[%s1347_s4] ss:$0 sm:$0xff]  ;;  %s793_s4 = sshll.u32 %s1143_s3, 4  ;;  %s794_s4 = int_to_ptr.vmem [resolvable:$true] %s793_s4 }
  0x43   :  { %1049 = vmatmul.mubr.bf16.vlgmr.msra.gmra.mrb[0].mxu0 %v576_v22  ;;  %1004 = vmatprep.mubr.bf16.mxu1 %v1236_v20  ;;  %s1119_s18 = scalar_lea.vmem %s794_s4, 448  ;;  %p1124_p1 = scmp.lt.s32.totalorder %s794_s4, %s794_s4 }
  0x44   :  { %1052 = vmatprep.mubr.bf16.mxu0 %v578_v23  ;;  %p1120_p0 = scmp.ne.s32.totalorder %s794_s4, %s1119_s18  ;;  %p1125_p2 = scmp.lt.s32.totalorder %s1119_s18, %s1119_s18 }
  0x46   :  { %p1126_p3 = por %p1125_p2, %p1124_p1 }
  0x48   :  { %p1127_p4 = pnand %p1126_p3, %p1120_p0 }
  0x4a   :  { %1005 = vmatmul.mubr.bf16.gmra.mrb[4].mxu1 %v86_v24 }
  0x4b   :  { %1053 = vmatmul.mubr.bf16.gmra.mrb[4].mxu0 %v577_v12 }
 0x115   :  { %v1002_v25 = vpop.f32.mrb[0].mxu1 }
 0x116   :  { %v1050_v26 = vpop.f32.mrb[0].mxu0  ;;  %v351_v28 = vpop.f32.mrb[1].mxu1 }
 0x117   :  { %v1056_v29 = vadd.f32 %v1050_v26, %v1002_v25  ;;  %v665_v30 = vpop.f32.mrb[1].mxu0  ;;  %v1003_v31 = vpop.f32.mrb[2].mxu1 }
 0x118   :  { %v1057_v32 = vadd.f32 %v665_v30, %v351_v28  ;;  %v1051_v20 = vpop.f32.mrb[2].mxu0  ;;  %v354_v33 = vpop.f32.mrb[3].mxu1 }
 0x119   :  { %v711_v34 = vmul.f32 %v1056_v29, %v896_v27  ;;  %v1058_v35 = vadd.f32 %v1051_v20, %v1003_v31  ;;  %v668_v36 = vpop.f32.mrb[3].mxu0 }
 0x11a   :  { %v709_v37 = vmul.f32 %v1057_v32, %v896_v27  ;;  %v1059_v38 = vadd.f32 %v668_v36, %v354_v33 }
 0x11b   :  { %v725_v39 = vadd.f32 %v897_v13, %v711_v34  ;;  %v712_v40 = vmul.f32 %v1058_v35, %v896_v27 }
 0x11c   :  { %v723_v41 = vadd.f32 %v897_v13, %v709_v37  ;;  %v710_v42 = vmul.f32 %v1059_v38, %v896_v27 }
 0x11d   :  { %vm732_vm3 = vcmp.ge.f32.partialorder %v725_v39, 0.0  ;;  %v739_v43 = vmul.f32 0.1, %v725_v39  ;;  %v726_v44 = vadd.f32 %v897_v13, %v712_v40  ;;  %v1006_v45 = vpop.f32.mrb[4].mxu1 }
 0x11e   :  { %vm730_vm5 = vcmp.ge.f32.partialorder %v723_v41, 0.0  ;;  %v737_v46 = vmul.f32 0.1, %v723_v41  ;;  %v724_v47 = vadd.f32 %v897_v13, %v710_v42  ;;  %v1054_v48 = vpop.f32.mrb[4].mxu0  ;;  %v367_v49 = vpop.f32.mrb[5].mxu1 }
 0x11f   :  { %v746_v50 = vsel %vm732_vm3, %v725_v39, %v739_v43  ;;  %vm733_vm6 = vcmp.ge.f32.partialorder %v726_v44, 0.0  ;;  %v740_v51 = vmul.f32 0.1, %v726_v44  ;;  %v1060_v52 = vadd.f32 %v1054_v48, %v1006_v45  ;;  %v681_v53 = vpop.f32.mrb[5].mxu0  ;;  %v1007_v54 = vpop.f32.mrb[6].mxu1 }
 0x120   :  { %v907_v55 = vpack.c.bf16 %v746_v50, %v746_v50  ;;  %v744_v56 = vsel %vm730_vm5, %v723_v41, %v737_v46  ;;  %vm731_vm7 = vcmp.ge.f32.partialorder %v724_v47, 0.0  ;;  %v738_v57 = vmul.f32 0.1, %v724_v47  ;;  %v1055_v58 = vpop.f32.mrb[6].mxu0  ;;  %v370_v59 = vpop.f32.mrb[7].mxu1 }
 0x121   :  { %v905_v60 = vpack.c.bf16 %v744_v56, %v744_v56  ;;  %v747_v61 = vsel %vm733_vm6, %v726_v44, %v740_v51  ;;  %v715_v62 = vmul.f32 %v1060_v52, %v896_v27  ;;  %v1061_v63 = vadd.f32 %v681_v53, %v367_v49  ;;  %v684_v0 = vpop.f32.mrb[7].mxu0 }
 0x122   :  { %783 = vst.msk [vmem:[#allocation3 + $0x8] sm:$0xf] %vm780_vm4, %v907_v55  ;;  %v908_v1 = vpack.c.bf16 %v747_v61, %v747_v61  ;;  %v745_v2 = vsel %vm731_vm7, %v724_v47, %v738_v57  ;;  %v1062_v3 = vadd.f32 %v684_v0, %v370_v59 }
 0x123   :  { %781 = vst.msk [vmem:[#allocation3] sm:$0xf] %vm780_vm4, %v905_v60  ;;  %v906_v4 = vpack.c.bf16 %v745_v2, %v745_v2  ;;  %v729_v5 = vadd.f32 %v897_v13, %v715_v62  ;;  %v713_v6 = vmul.f32 %v1061_v63, %v896_v27 }
 0x124   :  { %784 = vst.msk [vmem:[#allocation3 + $0xc] sm:$0xf] %vm780_vm4, %v908_v1  ;;  %v714_v7 = vmul.f32 %v1062_v3, %v896_v27 }
 0x125   :  { %782 = vst.msk [vmem:[#allocation3 + $0x4] sm:$0xf] %vm780_vm4, %v906_v4  ;;  %vm736_vm8 = vcmp.ge.f32.partialorder %v729_v5, 0.0  ;;  %v743_v8 = vmul.f32 0.1, %v729_v5  ;;  %v727_v9 = vadd.f32 %v897_v13, %v713_v6 }
 0x126   :  { %v728_v10 = vadd.f32 %v897_v13, %v714_v7 }
 0x127   :  { %v750_v11 = vsel %vm736_vm8, %v729_v5, %v743_v8  ;;  %vm734_vm9 = vcmp.ge.f32.partialorder %v727_v9, 0.0  ;;  %v741_v14 = vmul.f32 0.1, %v727_v9 }
 0x128   :  { %v911_v15 = vpack.c.bf16 %v750_v11, %v750_v11  ;;  %vm735_vm10 = vcmp.ge.f32.partialorder %v728_v10, 0.0  ;;  %v742_v16 = vmul.f32 0.1, %v728_v10 }
 0x129   :  { %v748_v17 = vsel %vm734_vm9, %v727_v9, %v741_v14 }
 0x12a   :  { %787 = vst.msk [vmem:[#allocation3 + $0x18] sm:$0xf] %vm780_vm4, %v911_v15  ;;  %v909_v18 = vpack.c.bf16 %v748_v17, %v748_v17  ;;  %v749_v19 = vsel %vm735_vm10, %v728_v10, %v742_v16 }
 0x12b   :  { %v910_v21 = vpack.c.bf16 %v749_v19, %v749_v19 }
 0x12c   :  { %785 = vst.msk [vmem:[#allocation3 + $0x10] sm:$0xf] %vm780_vm4, %v909_v18 }
 0x12d   :  { %786 = vst.msk [vmem:[#allocation3 + $0x14] sm:$0xf] %vm780_vm4, %v910_v21 }
 0x12e   :  { %1130 = shalt.err (!%p1127_p4)
}
 0x12f   :  { %s1131_s21 = scalar_lea.hbm %s1348_s5, 448 }
 0x130   :  { %p1132_p5 = scmp.ne.s32.totalorder %s1348_s5, %s1131_s21  ;;  %p1135_p6 = scmp.lt.u32.totalorder %s1131_s21, %s1348_s5 }
 0x132   :  { %p1137_p7 = pnand %p1135_p6, %p1132_p5 }
 0x134   :  { %1140 = shalt.err (!%p1137_p7)
}
 0x135   :  { %s1144_s24 = smov 64   ;;  %s1145_s25 = smov 4  }
 0x136   :  { %799 = dma.vmem_to_hbm [thread:$0]  %s794_s4, 448, %s1348_s5, [#allocation4], %s1144_s24, %s1144_s24, %s1145_s25  }
 0x137   :  { %1141 = dma.done.wait [#allocation4], 448  }
 0x138   :  { %1142 = vsyncadd [#allocation4], 4294966848 }
 0x139   :  { %803 = vsyncpa [#allocation4], 1 }

</bundles_post_ra>
